<compile_context>
chip_gen: v6e
topology: v6e:2x2x1
jax: 0.10.0
libtpu: 0.0.40
codegen_flags: <defaults>
</compile_context>

<pallas_src>
from functools import partial

import jax
import jax.numpy as jnp
from jax.experimental import pallas as pl
from jax.experimental.pallas import tpu as pltpu


_GOLDEN = 0x9E3779B9  # integer golden ratio, mixes the seed into the counter


# ----------------------------------------------------------------------------------
# Kernels
# ----------------------------------------------------------------------------------
def _pe_eval_kernel(x_ref, pe_ref, o_ref):
    # x_ref: (BR, BC), pe_ref: (1, BC) -> broadcast add over rows (eval / p == 0).
    o_ref[...] = x_ref[...] + pe_ref[...]


def _pe_train_kernel_hw(seed_ref, x_ref, pe_ref, o_ref, *, thresh, inv_keep):
    """Dropout(x + pe) using the TPU hardware PRNG (fast path on real chips)."""
    # Re-seed per grid step with the program ids so the mask is deterministic and
    # independent of execution order ("parallel" grid axes / megacore sharding).
    pltpu.prng_seed(seed_ref[0], pl.program_id(0), pl.program_id(1))
    bits = pltpu.prng_random_bits(x_ref.shape)
    if bits.dtype != jnp.uint32:
        bits = pltpu.bitcast(bits, jnp.uint32)
    val = x_ref[...].astype(jnp.float32) + pe_ref[...].astype(jnp.float32)
    keep = bits >= jnp.uint32(thresh)               # drop iff uniform u32 < p * 2^32
    o_ref[...] = jnp.where(keep, val * jnp.float32(inv_keep),
                           jnp.float32(0.0)).astype(o_ref.dtype)


def _uniform_hash_u32(shape, row0, col0, total_cols, seed_u32):
    """Counter-based per-element uniform uint32: lowbias32 hash of the flat index.

    NOTE: index math is uint32; for tensors with >= 2^32 elements the pattern would
    wrap (not reachable at practical activation sizes).  Fallback path only.
    """
    r = jax.lax.broadcasted_iota(jnp.int32, shape, 0)
    c = jax.lax.broadcasted_iota(jnp.int32, shape, 1)
    idx = ((r + row0).astype(jnp.uint32) * jnp.uint32(total_cols)
           + (c + col0).astype(jnp.uint32))
    h = idx ^ (seed_u32 * jnp.uint32(_GOLDEN))
    h = h ^ (h >> 16)
    h = h * jnp.uint32(0x7FEB352D)
    h = h ^ (h >> 15)
    h = h * jnp.uint32(0x846CA68B)
    h = h ^ (h >> 16)
    return h


def _pe_train_kernel_hash(seed_ref, x_ref, pe_ref, o_ref, *,
                          thresh, inv_keep, block_rows, block_cols, total_cols):
    """Stateless-hash fallback (non-TPU backends / interpret mode only)."""
    cb = pl.program_id(0)            # column-block index (selects the PE tile)
    rb = pl.program_id(1)            # row-block index (fastest-varying)
    bits = _uniform_hash_u32((block_rows, block_cols),
                             rb * block_rows, cb * block_cols,
                             total_cols, seed_ref[0].astype(jnp.uint32))
    val = x_ref[...].astype(jnp.float32) + pe_ref[...].astype(jnp.float32)
    keep = bits >= jnp.uint32(thresh)
    o_ref[...] = jnp.where(keep, val * jnp.float32(inv_keep),
                           jnp.float32(0.0)).astype(o_ref.dtype)


# ----------------------------------------------------------------------------------
# Tiling / budgets
# ----------------------------------------------------------------------------------
def _budgets():
    """(block_target_bytes, vmem_limit_bytes), generation-aware with safe fallback."""
    vmem_phys = 64 << 20                     # conservative default (v7x-sized)
    try:
        info = pltpu.get_tpu_info()
        vmem_phys = int(getattr(info, "vmem_capacity_bytes", vmem_phys))
    except Exception:
        pass
    if vmem_phys >= (100 << 20):             # v5e / v6e: 128 MiB physical VMEM
        return 12 << 20, 96 << 20
    return 8 << 20, 48 << 20                 # v7x: 64 MiB physical VMEM


def _largest_div_128(n_cols, cap):
    """Largest multiple of 128 that divides n_cols and is <= cap (0 if none)."""
    cap = min(cap, n_cols)
    d = (cap // 128) * 128
    while d >= 128:
        if n_cols % d == 0:
            return d
        d -= 128
    return 0


def _choose_tiles(n_rows, n_cols, itemsize, block_target_bytes):
    """Pick (row_tile, col_tile); n_cols is a multiple of 128 (wrapper guarantees)."""
    # Column tile cap: (a) padded + double-buffered PE block (~64 B/col, since a
    # (1, bc) block is stored with 8 sublanes for f32 / 16 for bf16) stays <= 4 MiB;
    # (b) even an 8-row x block stays under the per-block byte target.
    col_cap = min(n_cols,
                  (4 << 20) // 64,
                  max(128, block_target_bytes // (8 * itemsize)))
    bc = _largest_div_128(n_cols, col_cap) or n_cols

    # Row tile: fill the block target (full height if it fits, else multiple of 8).
    if n_rows * bc * itemsize <= block_target_bytes:
        br = n_rows
    else:
        br = max(8, (block_target_bytes // (bc * itemsize)) // 8 * 8)
        br = min(br, n_rows)

    # Guarantee >= 2 grid blocks where possible: enables megacore sharding on v7x and
    # DMA/compute pipelining overlap on every generation.
    if br >= n_rows and bc >= n_cols:
        half = _largest_div_128(n_cols, n_cols // 2)
        if half:
            bc = half
        elif n_rows >= 16:
            br = max(8, (n_rows // 2) // 8 * 8)
    return int(br), int(bc)


# ----------------------------------------------------------------------------------
# Wrapper
# ----------------------------------------------------------------------------------
def positional_encoding(x, table, *, drop_p=0.1, training=False, seed=0,
                        donate_x=False):
    """output = dropout(x + encoding[:S]) ; x: (N, S, D), table: (max_len, D)."""
    N, S, D = x.shape
    L = S * D

    if training and drop_p >= 1.0:
        return jnp.zeros_like(x)     # avoid uint32 threshold wrap / inf scale

    # Lane-dense layout: flatten (S, D) into the last axis so stores are full-lane
    # vst's even when D < 128; pad the flattened axis up to a multiple of 128 so
    # every tile is 128-aligned (tail sliced off afterwards).
    L_pad = ((L + 127) // 128) * 128
    x2 = x.reshape(N, L)
    pe2 = table[:S].reshape(1, L).astype(x.dtype)
    if L_pad != L:
        x2 = jnp.pad(x2, ((0, 0), (0, L_pad - L)))
        pe2 = jnp.pad(pe2, ((0, 0), (0, L_pad - L)))

    block_target, vmem_limit = _budgets()
    br, bc = _choose_tiles(N, L_pad, x.dtype.itemsize, block_target)
    grid = (pl.cdiv(L_pad, bc), pl.cdiv(N, br))   # rows fastest -> PE tile resident

    out_shape = jax.ShapeDtypeStruct((N, L_pad), x.dtype)
    cparams = pltpu.CompilerParams(
        dimension_semantics=("parallel", "parallel"),
        vmem_limit_bytes=vmem_limit,
    )
    cost = pl.CostEstimate(
        flops=3 * N * L_pad,
        transcendentals=0,
        bytes_accessed=(2 * N * L_pad + L_pad) * x.dtype.itemsize,
    )

    if (not training) or drop_p == 0.0:
        out2 = pl.pallas_call(
            _pe_eval_kernel,
            out_shape=out_shape,
            grid_spec=pltpu.PrefetchScalarGridSpec(
                num_scalar_prefetch=0,
                grid=grid,
                in_specs=[pl.BlockSpec((br, bc), lambda c, r: (r, c)),
                          pl.BlockSpec((1, bc), lambda c, r: (0, c))],
                out_specs=pl.BlockSpec((br, bc), lambda c, r: (r, c)),
            ),
            compiler_params=cparams,
            cost_estimate=cost,
            input_output_aliases=({0: 0} if donate_x else {}),
        )(x2, pe2)
    else:
        thresh = min(int(round(drop_p * 4294967296.0)), 4294967295)
        inv_keep = 1.0 / (1.0 - drop_p)
        seed_arr = jnp.asarray([seed], dtype=jnp.int32)

        if jax.default_backend() == "tpu":
            kernel = partial(_pe_train_kernel_hw, thresh=thresh, inv_keep=inv_keep)
        else:
            # TODO(synk): stateless-hash fallback is only for non-TPU / interpret
            # runs; it does not bit-match torch's RNG (keep-rate statistics match).
            kernel = partial(_pe_train_kernel_hash, thresh=thresh, inv_keep=inv_keep,
                             block_rows=br, block_cols=bc, total_cols=L_pad)

        out2 = pl.pallas_call(
            kernel,
            out_shape=out_shape,
            grid_spec=pltpu.PrefetchScalarGridSpec(
                num_scalar_prefetch=1,            # seed lands in SMEM
                grid=grid,
                in_specs=[pl.BlockSpec((br, bc), lambda c, r, s: (r, c)),
                          pl.BlockSpec((1, bc), lambda c, r, s: (0, c))],
                out_specs=pl.BlockSpec((br, bc), lambda c, r, s: (r, c)),
            ),
            compiler_params=cparams,
            cost_estimate=cost,
            input_output_aliases=({1: 0} if donate_x else {}),  # arg 0 is the seed
        )(seed_arr, x2, pe2)

    if L_pad != L:
        out2 = out2[:, :L]
    return out2.reshape(N, S, D)


# ----------------------------------------------------------------------------------
# Demo / self-check
# ----------------------------------------------------------------------------------
if __name__ == "__main__":
    key = jax.random.PRNGKey(0)
    kx, kt, kx2 = jax.random.split(key, 3)

    # Small shapes consistent with the module's forward: x is (N, S, D).
    N, S, D = 2, 8, 32
    max_len = 5000  # matches the module default

    x = jax.random.normal(kx, (N, S, D), dtype=jnp.float32)
    # nn.Embedding weights default-init ~ N(0, 1); deterministic synthetic init here.
    table = jax.random.normal(kt, (max_len, D), dtype=jnp.float32)

    ref = x + table[:S][None, :, :]

    # 1) Eval-mode forward (dropout = identity), checked against pure-JAX reference.
    out_eval = jax.block_until_ready(positional_encoding(x, table, training=False))
    assert out_eval.shape == (N, S, D)
    assert jnp.allclose(out_eval, ref, atol=1e-6), "eval-mode mismatch"

    # 2) Training-mode forward (inverted dropout, p=0.1).
    p = 0.1
    out_train = jax.block_until_ready(
        positional_encoding(x, table, drop_p=p, training=True, seed=1234))
    scaled_ref = ref / (1.0 - p)
    # Every element is either exactly zero (dropped) or (x + pe) / (1 - p) (kept).
    ok = jnp.isclose(out_train, scaled_ref, atol=1e-5) | (out_train == 0.0)
    assert bool(jnp.all(ok)), "train-mode mismatch"
    keep_frac = float(jnp.mean((out_train != 0.0).astype(jnp.float32)))
    assert 0.6 < keep_frac <= 1.0, f"implausible keep fraction {keep_frac}"

    # 3) Ragged flattened width (S*D not a multiple of 128) exercises the padding path.
    N2, S2, D2 = 3, 33, 20
    xr = jax.random.normal(kx2, (N2, S2, D2), dtype=jnp.float32)
    tabler = jax.random.normal(kt, (max_len, D2), dtype=jnp.float32)
    refr = xr + tabler[:S2][None, :, :]
    out_r = jax.block_until_ready(positional_encoding(xr, tabler, training=False))
    assert out_r.shape == (N2, S2, D2)
    assert jnp.allclose(out_r, refr, atol=1e-6), "ragged eval-mode mismatch"

    print("KERNEL_OK")
</pallas_src>

<mosaic_0001>
module attributes {stable_mosaic.version = 11 : i64} {
  func.func @_pe_eval_kernel(%arg0: i32, %arg1: i32, %arg2: memref<2x128xf32, #tpu.memory_space<vmem>>, %arg3: memref<1x128xf32, #tpu.memory_space<vmem>>, %arg4: memref<2x128xf32, #tpu.memory_space<vmem>>) attributes {dimension_semantics = [#tpu.dimension_semantics<parallel>, #tpu.dimension_semantics<parallel>], iteration_bounds = array<i64: 2, 1>, scalar_prefetch = 0 : i64, scratch_operands = 0 : i64, tpu.core_type = #tpu.core_type<tc>, window_params = [{transform_indices = @transform_0, window_bounds = array<i64: 2, 128>}, {transform_indices = @transform_1, window_bounds = array<i64: 1, 128>}, {transform_indices = @transform_2, window_bounds = array<i64: 2, 128>}]} {
    %c0 = arith.constant 0 : index
    %c0_0 = arith.constant 0 : index
    %0 = vector.load %arg2[%c0, %c0_0] : memref<2x128xf32, #tpu.memory_space<vmem>>, vector<2x128xf32>
    %c0_1 = arith.constant 0 : index
    %c0_2 = arith.constant 0 : index
    %1 = vector.load %arg3[%c0_1, %c0_2] : memref<1x128xf32, #tpu.memory_space<vmem>>, vector<1x128xf32>
    %2 = vector.broadcast %1 : vector<1x128xf32> to vector<2x128xf32>
    %3 = arith.addf %0, %2 : vector<2x128xf32>
    %c0_3 = arith.constant 0 : index
    %c0_4 = arith.constant 0 : index
    %4 = vector.load %arg4[%c0_3, %c0_4] : memref<2x128xf32, #tpu.memory_space<vmem>>, vector<2x128xf32>
    tpu.vector_store %arg4[%c0_3, %c0_4], %3 {strides = array<i32>} : memref<2x128xf32, #tpu.memory_space<vmem>>, vector<2x128xf32>,
    return
  }
  func.func @transform_0(%arg0: i32, %arg1: i32) -> (i32, i32) {
    %c0_i32 = arith.constant 0 : i32
    return %arg1, %arg0 : i32, i32
  }
  func.func @transform_1(%arg0: i32, %arg1: i32) -> (i32, i32) {
    %c0_i32 = arith.constant 0 : i32
    %c0_i32_0 = arith.constant 0 : i32
    return %c0_i32, %arg0 : i32, i32
  }
  func.func @transform_2(%arg0: i32, %arg1: i32) -> (i32, i32) {
    %c0_i32 = arith.constant 0 : i32
    return %arg1, %arg0 : i32, i32
  }
}

</mosaic_0001>

<bundles_post_ra>
// kernel: tpu_custom_call.1
= control target key start
LH: loop header
LB: loop body
LE: loop exit
PB: predicated region body
PF: predicated region fallthrough
CT: control target
= control target key end

     0   :  { %7 = vsyncpa [#allocation3], 0  ;;  %s745_s0 = inlined_call_operand.hbm [shape: f32[2,256], index: 0, kind: input, shape index: {}]   ;;  %s746_s1 = inlined_call_operand.hbm [shape: f32[1,256], index: 1, kind: input, shape index: {}]   ;;  %s747_s2 = inlined_call_operand.hbm [shape: f32[2,256], index: 2, kind: output, shape index: {}]  }
   0x1   :  { %9 = vsyncpa [#allocation3 + $0x1], 0 }
   0x2   :  { %10 = vsyncpa [#allocation6], 0 }
   0x3   :  { %12 = vsyncpa [#allocation6 + $0x1], 0 }
   0x4   :  { %13 = vsyncpa [#allocation4], 0 }
   0x5   :  { %15 = vsyncpa [#allocation4 + $0x1], 0  ;;  %s581_s9 = smov 0   ;;  %s583_s10 = smov 0  }
   0x6   :  { %s585_s11 = smov 0   ;;  %s587_s12 = smov 0  }
   0x7   :  { %s589_s13 = smov 0   ;;  %s591_s14 = smov 0  }
   0x8 LB: > { %s339_s15 = sadd.s32 4294967295, %s561_s14   ;;  %s340_s16 = sadd.s32 4294967294, %s561_s14   ;;  %s561_s14 = sphi %s591_s14, %s21_s14   ;;  %s557_s13 = sphi %s589_s13, %s759_s13   ;;  %s553_s12 = sphi %s587_s12, %s758_s12   ;;  %s549_s11 = sphi %s585_s11, %s757_s11   ;;  %s545_s10 = sphi %s583_s10, %s756_s10   ;;  %s541_s9 = sphi %s581_s9, %s755_s9  }
   0x9   : > { %s33_s17 = sadd.s32 1, %s557_s13  ;;  %s42_s18 = sadd.s32 1, %s549_s11 }
   0xa   : > { %p35_p0 = scmp.ge.s32.totalorder %s33_s17, 2  ;;  %p49_p1 = scmp.ne.s32.totalorder %s549_s11, %s545_s10 }
   0xb   : > { %p50_p2 = scmp.eq.s32.totalorder %s561_s14, 0  ;;  %p55_p3 = scmp.ne.s32.totalorder %s545_s10, %s541_s9 }
   0xc   : > { %s761_s17 = smov (%p35_p0, %s33_s17), 0  ;;  %p56_p5 = scmp.eq.s32.totalorder %s339_s15, 0 }
   0xd   : > { %p622_p4 = por %p50_p2, %p49_p1  ;;  %s38_s20 = ssub.s32 %s557_s13, %s761_s17 }
   0xe   : > { %p107_p6 = scmp.eq.s32.totalorder %s339_s15, 1  ;;  %p40_p7 = scmp.eq.s32.totalorder %s38_s20, 0 }
   0xf   : > { %p628_p8 = por %p56_p5, %p55_p3  ;;  %p113_p10 = scmp.eq.s32.totalorder %s340_s16, 1 }
  0x10   : > { %p632_p9 = por %p107_p6, %p49_p1  ;;  %p371_p13 = scmp.lt.s32.totalorder %s561_s14, 2 }
  0x11   : > { %s637_s23 = scalar_select %p40_p7, %s549_s11, %s42_s18  }
  0x12   : > { %p639_p11 = por %p113_p10, %p55_p3  ;;  %s646_s25 = sand.u32 1, %s549_s11  }
  0x13   : > { %s343_s26 = sshll.u32 %s646_s25, 1  ;;  %s344_s27 = sshll.u32 %s557_s13, 5 }
  0x14   : > { %s144_s30 = scalar_lea.hbm %s745_s0, %s344_s27  ;;  %s137_s3 = scalar_lea.vmem [#allocation2], %s343_s26 }
  0x15   : > { %s146_s4 = sshll.u32 %s137_s3, 4  ;;  %p655_p0 = pnand %p371_p13, %p622_p4  ;;  %s147_s4 = int_to_ptr.vmem [resolvable:$true] %s146_s4 }
  0x16   : > { %p346_p1 = scmp.ge.s32.totalorder %s561_s14, 1  ;;  %p168_p2 = scmp.lt.s32.totalorder %s561_s14, 3 }
  0x17   : > { %s134_s6 = scalar_lea.sflag [#allocation3], %s646_s25  ;;  %p423_p3 = pneg %p655_p0 }
  0x18   : > { %s434_s7 = scalar_lea.vmem %s147_s4, 32  ;;  %s563_s8 = smov [#allocation2]  }
  0x19   : > { %p435_p5 = scmp.ne.s32.totalorder %s147_s4, %s434_s7  ;;  %s439_s15 = sshll.u32 %s563_s8, 4  ;;  %s440_s15 = int_to_ptr.vmem [resolvable:$false] %s439_s15 }
  0x1a   : > { %s441_s16 = scalar_lea.vmem %s440_s15, 64  ;;  %p442_p4 = scmp.lt.s32.totalorder %s147_s4, %s440_s15 }
  0x1b   : > { %p437_p6 = pnand %p435_p5, %p423_p3  ;;  %p443_p10 = scmp.lt.s32.totalorder %s441_s16, %s434_s7 }
  0x1d   : > { %p438_p7 = pneg %p437_p6  ;;  %p444_p13 = por %p443_p10, %p442_p4 }
  0x1f   : > { %p445_p12 = pnand %p444_p13, %p438_p7 }
  0x21   : > { %448 = shalt.err (!%p445_p12)
}
  0x22   : > { %363 = dma.hbm_to_vmem [thread:$0]  (!%p655_p0), %s144_s30, 32, %s147_s4, %s134_s6  }
  0x23   : > { %p673_p5 = pnand %p346_p1, %p168_p2  ;;  %s345_s19 = sshll.u32 %s557_s13, 4 }
  0x24   : > { %s156_s20 = scalar_lea.vmem [#allocation5], %s646_s25  ;;  %s161_s29 = scalar_lea.hbm %s746_s1, %s345_s19 }
  0x25   : > { %s163_s26 = sshll.u32 %s156_s20, 4  ;;  %s154_s3 = scalar_lea.sflag [#allocation6], %s646_s25  ;;  %s164_s26 = int_to_ptr.vmem [resolvable:$true] %s163_s26 }
  0x26   : > { %s462_s7 = scalar_lea.vmem %s164_s26, 16  ;;  %s564_s30 = smov [#allocation5]  }
  0x27   : > { %p463_p12 = scmp.ne.s32.totalorder %s164_s26, %s462_s7  ;;  %s467_s4 = sshll.u32 %s564_s30, 4  ;;  %s468_s4 = int_to_ptr.vmem [resolvable:$false] %s467_s4 }
  0x28   : > { %s469_s6 = scalar_lea.vmem %s468_s4, 32  ;;  %p470_p1 = scmp.lt.s32.totalorder %s164_s26, %s468_s4 }
  0x29   : > { %p465_p6 = pnand %p463_p12, %p423_p3  ;;  %p471_p2 = scmp.lt.s32.totalorder %s469_s6, %s462_s7 }
  0x2b   : > { %p466_p7 = pneg %p465_p6  ;;  %p472_p4 = por %p471_p2, %p470_p1 }
  0x2d   : > { %p473_p10 = pnand %p472_p4, %p466_p7 }
  0x2f   : > { %476 = shalt.err (!%p473_p10)
}
  0x30   : > { %366 = dma.hbm_to_vmem [thread:$0]  (!%p655_p0), %s161_s29, 16, %s164_s26, %s154_s3  }
  0x31   : > { %172 = sbr.rel (%p673_p5) target bundleno = 81 (0x51), region = 28  ;;  %s691_s25 = sand.u32 (!%p673_p5), 1, %s545_s10  }
  0x32   : > { %s347_s8 = sshll.u32 (!%p673_p5), %s691_s25, 1  ;;  %s175_s15 = scalar_lea.sflag (!%p673_p5), [#allocation3], %s691_s25 }
  0x33   : > { %s178_s16 = scalar_lea.vmem (!%p673_p5), [#allocation2], %s347_s8 }
  0x36   : > { %528 = dma.done.wait (%p628_p8), %s175_s15, 32  }
  0x37   : > { %530 = vsyncadd (%p628_p8), %s175_s15, 4294967264  ;;  %s184_s5 = scalar_lea.sflag [#allocation6], %s691_s25  ;;  %s186_s18 = scalar_lea.vmem [#allocation5], %s691_s25 }
  0x38   : > { %532 = dma.done.wait (%p628_p8), %s184_s5, 16  }
  0x39   : > { %534 = vsyncadd (%p628_p8), %s184_s5, 4294967280  ;;  %s210_s19 = scalar_lea.vmem [#allocation7], %s347_s8  ;;  %s351_s26 = sshll.u32 %s553_s12, 5  ;;  %v211_v0 = vld [vmem:[%s178_s16] sm:$0x3] }
  0x3a   : > { %s237_s20 = sshll.u32 %s210_s19, 4  ;;  %v349_v1 = vld [vmem:[%s186_s18] ss:$0 sm:$0xff]  ;;  %s235_s29 = scalar_lea.hbm %s747_s2, %s351_s26  ;;  %s238_s20 = int_to_ptr.vmem [resolvable:$true] %s237_s20 }
  0x3b   : > { %v219_v2 = vadd.f32 %v349_v1, %v211_v0  ;;  %s222_s3 = scalar_lea.sflag [#allocation4], %s691_s25  ;;  %s477_s7 = scalar_lea.vmem %s238_s20, 32 }
  0x3c   : > { %p478_p0 = scmp.ne.s32.totalorder %s238_s20, %s477_s7  ;;  %s565_s21 = smov [#allocation7]  }
  0x3d   : > { %220 = vst [vmem:[%s210_s19] sm:$0x3] %v219_v2  ;;  %s481_s30 = sshll.u32 %s565_s21, 4  ;;  %s482_s30 = int_to_ptr.vmem [resolvable:$false] %s481_s30 }
  0x3e   : > { %p479_p8 = pnand %p478_p0, %p632_p9  ;;  %s483_s4 = scalar_lea.vmem %s482_s30, 64 }
  0x3f   : > { %p484_p13 = scmp.lt.s32.totalorder %s238_s20, %s482_s30  ;;  %p485_p5 = scmp.lt.s32.totalorder %s483_s4, %s477_s7 }
  0x40   : > { %p480_p3 = pneg %p479_p8 }
  0x41   : > { %p486_p12 = por %p485_p5, %p484_p13 }
  0x43   : > { %p487_p6 = pnand %p486_p12, %p480_p3 }
  0x45   : > { %490 = shalt.err (!%p487_p6)
}
  0x46   : > { %s491_s12 = scalar_lea.hbm %s235_s29, 32  ;;  %s495_s8 = scalar_lea.hbm %s747_s2, 64 }
  0x47   : > { %p492_p7 = scmp.ne.s32.totalorder %s235_s29, %s491_s12  ;;  %p496_p4 = scmp.lt.s32.totalorder %s235_s29, %s747_s2 }
  0x48   : > { %p497_p10 = scmp.lt.s32.totalorder %s495_s8, %s491_s12 }
  0x49   : > { %p493_p1 = pnand %p492_p7, %p632_p9 }
  0x4a   : > { %p498_p0 = por %p497_p10, %p496_p4 }
  0x4b   : > { %p494_p2 = pneg %p493_p1 }
  0x4d   : > { %p499_p8 = pnand %p498_p0, %p494_p2 }
  0x4f   : > { %502 = shalt.err (!%p499_p8)
}
  0x50   : > { %358 = dma.vmem_to_hbm [thread:$0]  (%p632_p9), %s238_s20, 32, %s235_s29, %s222_s3  }
  0x51 PF: > { %s249_s5 = sand.u32 1, %s541_s9   ;;  %p754_p3 = scmp.ge.s32.totalorder %s561_s14, 2 }
  0x52   : > { %s250_s18 = scalar_lea.sflag [#allocation4], %s249_s5 }
  0x53   : > { %p368_p13 = pnand %p754_p3, %p639_p11 }
  0x55   : > { %p369_p5 = pneg %p368_p13 }
  0x57   : > { %536 = dma.done.wait (%p369_p5), %s250_s18, 32  }
  0x58   : > { %538 = vsyncadd (%p369_p5), %s250_s18, 4294967264  ;;  %s21_s14 = sadd.s32 1, %s561_s14   ;;  %s755_s9 = smov %s545_s10 }
  0x59   : > { %p18_p12 = scmp.ge.s32.totalorder %s21_s14, 4   ;;  %s756_s10 = smov %s549_s11 }
  0x5a   : > { %s757_s11 = smov %s637_s23  ;;  %s758_s12 = smov %s557_s13 }
  0x5b   : > { %s759_s13 = smov %s761_s17  ;;  %20 = sbr.rel (!%p18_p12) target bundleno = 8 (0x8), region = 86 }
  0x60   :  { %255 = vsyncpa [#allocation3], 1 }
  0x61   :  { %257 = vsyncpa [#allocation3 + $0x1], 1 }
  0x62   :  { %258 = vsyncpa [#allocation6], 1 }
  0x63   :  { %260 = vsyncpa [#allocation6 + $0x1], 1 }
  0x64   :  { %261 = vsyncpa [#allocation4], 1 }
  0x65   :  { %263 = vsyncpa [#allocation4 + $0x1], 1 }

</bundles_post_ra>
